<compile_context>
chip_gen: v7x
topology: tpu7x:2x2x1
jax: 0.10.0
libtpu: 0.0.40
codegen_flags: <defaults>
</compile_context>

<pallas_src>
from functools import partial

import jax
import jax.numpy as jnp
from jax.experimental import pallas as pl
from jax.experimental.pallas import tpu as pltpu


def _pick_tile_h(H, W, C):
    """Rows per H-tile (multiple of 8, or full H) targeting ~4 MiB f32 pred slab."""
    target_bytes = 4 * 1024 * 1024
    rows = target_bytes // max(1, C * W * 4)
    rows = max(8, (rows // 8) * 8)
    if rows >= H:
        return H, 1
    return rows, -(-H // rows)          # (TH, num H tiles)


def _make_dice_kernel(C, H, TH, kh_per_part, needs_mask):
    def kernel(t_ref, p_ref, inter_ref, union_ref, inter_acc, union_acc):
        # t_ref: (TH, W) int32 labels ; p_ref: (C, TH, W) native-dtype prediction
        k = pl.program_id(2)

        @pl.when(k == 0)
        def _zero():
            inter_acc[...] = jnp.zeros_like(inter_acc)
            union_acc[...] = jnp.zeros_like(union_acc)

        t = t_ref[...]                                   # (TH, W) int32
        p = p_ref[...].astype(jnp.float32)               # (C, TH, W) f32 accumulation

        if needs_mask:
            # Global H row of every sublane row in this block; rows >= H belong
            # to a ragged / over-partitioned tail tile (stale VMEM contents) and
            # must contribute nothing.
            part = pl.program_id(1)
            h_start = (part * kh_per_part + k) * TH
            row_id = h_start + jax.lax.broadcasted_iota(jnp.int32, t.shape, 0)
            row_valid = row_id < H                       # (TH, W) bool
            t = jnp.where(row_valid, t, -1)              # -1 matches no class
            p_union = jnp.where(row_valid[None, :, :], p, 0.0)
        else:
            p_union = p

        cls = jax.lax.broadcasted_iota(jnp.int32, p.shape, 0)   # class id per C-row
        mask = cls == t[None, :, :]                              # in-register one-hot

        def _rsum(x):                                            # (C,TH,W) -> (C,1)
            return jnp.sum(jnp.sum(x, axis=2), axis=1, keepdims=True)

        # inter[c] += sum_hw pred[c] where label == c     (select => stale-NaN safe)
        inter_acc[...] += _rsum(jnp.where(mask, p, 0.0))
        # union[c] += count(label == c) + sum_hw pred[c]  (pred read exactly once)
        union_acc[...] += _rsum(mask.astype(jnp.float32)) + _rsum(p_union)

        @pl.when(k == pl.num_programs(2) - 1)
        def _store():
            inter_ref[...] = inter_acc[...]
            union_ref[...] = union_acc[...]

    return kernel


@partial(jax.jit, static_argnames=("num_h_parts",))
def multi_dice_loss(target, prediction, *, num_h_parts=2):
    """target: (N, 1, H, W) integer labels; prediction: (N, C, H, W) float.

    Returns (C-1,) vector: 1 - mean_n dice[n, c] for classes 1..C-1
    (the task='seg' path of the PyTorch module).
    """
    # TODO(synk): task='reg' branch (one-hot of an integer prediction map) is not
    # implemented; only the default task='seg' path is covered.
    N, C, H, W = prediction.shape

    if target.shape != (N, 1, H, W):
        target = target.reshape(N, 1, H, W)
    if target.dtype != jnp.int32:
        target = target.astype(jnp.int32)        # cheap: tensor is 1/C of pred

    TH, kh_total = _pick_tile_h(H, W, C)
    P = max(1, min(int(num_h_parts), kh_total))  # spatial partitions (v7x 2nd TC)
    kh_per = -(-kh_total // P)                   # H tiles per partition
    needs_mask = (P * kh_per * TH != H)          # any rows past H in the grid?
    needs_clamp = (P * kh_per > kh_total)        # any block index past the array?

    def _h_block(p, k):
        b = p * kh_per + k
        if needs_clamp:
            b = jnp.minimum(b, kh_total - 1)     # keep DMA in bounds; mask kills it
        return b

    kernel = _make_dice_kernel(C, H, TH, kh_per, needs_mask)

    inter4, union4 = pl.pallas_call(
        kernel,
        out_shape=(jax.ShapeDtypeStruct((N, P, C, 1), jnp.float32),
                   jax.ShapeDtypeStruct((N, P, C, 1), jnp.float32)),
        grid_spec=pltpu.PrefetchScalarGridSpec(
            num_scalar_prefetch=0,
            grid=(N, P, kh_per),
            in_specs=[
                # labels: (TH, W) slab, batch & channel squeezed
                pl.BlockSpec((None, None, TH, W),
                             lambda n, p, k: (n, 0, _h_block(p, k), 0)),
                # prediction: (C, TH, W) slab, native dtype
                pl.BlockSpec((None, C, TH, W),
                             lambda n, p, k: (n, 0, _h_block(p, k), 0)),
            ],
            out_specs=[
                pl.BlockSpec((None, None, C, 1), lambda n, p, k: (n, p, 0, 0)),
                pl.BlockSpec((None, None, C, 1), lambda n, p, k: (n, p, 0, 0)),
            ],
            scratch_shapes=[
                pltpu.VMEM((C, 1), jnp.float32),   # inter accumulator
                pltpu.VMEM((C, 1), jnp.float32),   # union accumulator
            ],
        ),
        compiler_params=pltpu.CompilerParams(
            dimension_semantics=("parallel", "parallel", "arbitrary"),
            vmem_limit_bytes=40 * 1024 * 1024),
    )(target, prediction)

    inter = jnp.sum(inter4[..., 0], axis=1)      # (N, C): sum spatial partitions
    union = jnp.sum(union4[..., 0], axis=1)      # (N, C)

    dsc = (2.0 * inter / (union + 0.001))[:, 1:]
    return 1.0 - jnp.mean(dsc, axis=0)


if __name__ == "__main__":
    key = jax.random.PRNGKey(0)
    k_lbl, k_pred = jax.random.split(key)

    # Small shapes consistent with the module defaults (num_classes=6).
    N, C, H, W = 2, 6, 16, 16
    target = jax.random.randint(k_lbl, (N, 1, H, W), 0, C, dtype=jnp.int32)
    prediction = jax.nn.softmax(
        jax.random.normal(k_pred, (N, C, H, W), dtype=jnp.float32), axis=1)

    loss = multi_dice_loss(target, prediction)
    loss = jax.block_until_ready(loss)

    # Pure-JAX reference (mirrors the PyTorch module, task='seg').
    one_hot = jax.nn.one_hot(target[:, 0], C, axis=1, dtype=jnp.float32)  # (N,C,H,W)
    inter_ref = jnp.sum(one_hot * prediction, axis=(-1, -2))
    union_ref = jnp.sum(one_hot + prediction, axis=(-1, -2))
    dsc_ref = (2.0 * inter_ref / (union_ref + 0.001))[:, 1:]
    loss_ref = 1.0 - jnp.mean(dsc_ref, axis=0)

    assert loss.shape == (C - 1,)
    assert jnp.allclose(loss, loss_ref, atol=1e-5, rtol=1e-5), (loss, loss_ref)
    print("KERNEL_OK")
</pallas_src>

<mosaic_0001>
module attributes {stable_mosaic.version = 11 : i64} {
  func.func @kernel(%arg0: i32, %arg1: i32, %arg2: i32, %arg3: memref<1x1x16x16xi32, #tpu.memory_space<vmem>>, %arg4: memref<1x6x16x16xf32, #tpu.memory_space<vmem>>, %arg5: memref<1x1x6x1xf32, #tpu.memory_space<vmem>>, %arg6: memref<1x1x6x1xf32, #tpu.memory_space<vmem>>, %arg7: memref<6x1xf32, #tpu.memory_space<vmem>>, %arg8: memref<6x1xf32, #tpu.memory_space<vmem>>) attributes {dimension_semantics = [#tpu.dimension_semantics<parallel>, #tpu.dimension_semantics<parallel>, #tpu.dimension_semantics<arbitrary>], iteration_bounds = array<i64: 2, 1, 1>, scalar_prefetch = 0 : i64, scratch_operands = 2 : i64, tpu.core_type = #tpu.core_type<tc>, window_params = [{transform_indices = @transform_0, window_bounds = array<i64: 1, 1, 16, 16>}, {transform_indices = @transform_1, window_bounds = array<i64: 1, 6, 16, 16>}, {transform_indices = @transform_2, window_bounds = array<i64: 1, 1, 6, 1>}, {transform_indices = @transform_3, window_bounds = array<i64: 1, 1, 6, 1>}]} {
    %c0_i32 = arith.constant 0 : i32
    %0 = arith.cmpi eq, %arg2, %c0_i32 : i32
    %1 = arith.extui %0 : i1 to i32
    %c0_i32_0 = arith.constant 0 : i32
    %2 = arith.cmpi ne, %1, %c0_i32_0 : i32
    scf.if %2 {
      %cst_24 = arith.constant 0.000000e+00 : f32
      %34 = vector.broadcast %cst_24 : f32 to vector<6x1xf32>
      %c0_25 = arith.constant 0 : index
      %c0_26 = arith.constant 0 : index
      %35 = vector.load %arg7[%c0_25, %c0_26] : memref<6x1xf32, #tpu.memory_space<vmem>>, vector<6x1xf32>
      tpu.vector_store %arg7[%c0_25, %c0_26], %34 {strides = array<i32>} : memref<6x1xf32, #tpu.memory_space<vmem>>, vector<6x1xf32>,
      %cst_27 = arith.constant 0.000000e+00 : f32
      %36 = vector.broadcast %cst_27 : f32 to vector<6x1xf32>
      %c0_28 = arith.constant 0 : index
      %c0_29 = arith.constant 0 : index
      %37 = vector.load %arg8[%c0_28, %c0_29] : memref<6x1xf32, #tpu.memory_space<vmem>>, vector<6x1xf32>
      tpu.vector_store %arg8[%c0_28, %c0_29], %36 {strides = array<i32>} : memref<6x1xf32, #tpu.memory_space<vmem>>, vector<6x1xf32>,
    } else {
    }
    %c0 = arith.constant 0 : index
    %c0_1 = arith.constant 0 : index
    %c0_2 = arith.constant 0 : index
    %c0_3 = arith.constant 0 : index
    %3 = vector.load %arg3[%c0, %c0_1, %c0_2, %c0_3] : memref<1x1x16x16xi32, #tpu.memory_space<vmem>>, vector<1x1x16x16xi32>
    %4 = vector.shape_cast %3 : vector<1x1x16x16xi32> to vector<16x16xi32>
    %c0_4 = arith.constant 0 : index
    %c0_5 = arith.constant 0 : index
    %c0_6 = arith.constant 0 : index
    %c0_7 = arith.constant 0 : index
    %5 = vector.load %arg4[%c0_4, %c0_5, %c0_6, %c0_7] : memref<1x6x16x16xf32, #tpu.memory_space<vmem>>, vector<1x6x16x16xf32>
    %6 = vector.shape_cast %5 : vector<1x6x16x16xf32> to vector<6x16x16xf32>
    %7 = tpu.iota {dimensions = array<i32: 0>} : vector<6x16x16xi32>
    %8 = vector.shape_cast %4 : vector<16x16xi32> to vector<1x16x16xi32>
    %9 = vector.broadcast %8 : vector<1x16x16xi32> to vector<6x16x16xi32>
    %10 = arith.cmpi eq, %7, %9 : vector<6x16x16xi32>
    %c0_8 = arith.constant 0 : index
    %c0_9 = arith.constant 0 : index
    %11 = vector.load %arg7[%c0_8, %c0_9] : memref<6x1xf32, #tpu.memory_space<vmem>>, vector<6x1xf32>
    %cst = arith.constant 0.000000e+00 : f32
    %12 = vector.broadcast %cst : f32 to vector<6x16x16xf32>
    %13 = arith.select %10, %6, %12 : vector<6x16x16xi1>, vector<6x16x16xf32>
    %cst_10 = arith.constant dense<0.000000e+00> : vector<6x16xf32>
    %14 = vector.multi_reduction <add>, %13, %cst_10 [2] : vector<6x16x16xf32> to vector<6x16xf32>
    %cst_11 = arith.constant dense<0.000000e+00> : vector<6xf32>
    %15 = vector.multi_reduction <add>, %14, %cst_11 [1] : vector<6x16xf32> to vector<6xf32>
    %16 = vector.shape_cast %15 : vector<6xf32> to vector<6x1xf32>
    %17 = arith.addf %11, %16 : vector<6x1xf32>
    %c0_12 = arith.constant 0 : index
    %c0_13 = arith.constant 0 : index
    %18 = vector.load %arg7[%c0_12, %c0_13] : memref<6x1xf32, #tpu.memory_space<vmem>>, vector<6x1xf32>
    tpu.vector_store %arg7[%c0_12, %c0_13], %17 {strides = array<i32>} : memref<6x1xf32, #tpu.memory_space<vmem>>, vector<6x1xf32>,
    %c0_14 = arith.constant 0 : index
    %c0_15 = arith.constant 0 : index
    %19 = vector.load %arg8[%c0_14, %c0_15] : memref<6x1xf32, #tpu.memory_space<vmem>>, vector<6x1xf32>
    %20 = arith.extui %10 : vector<6x16x16xi1> to vector<6x16x16xi32>
    %21 = arith.sitofp %20 : vector<6x16x16xi32> to vector<6x16x16xf32>
    %cst_16 = arith.constant dense<0.000000e+00> : vector<6x16xf32>
    %22 = vector.multi_reduction <add>, %21, %cst_16 [2] : vector<6x16x16xf32> to vector<6x16xf32>
    %cst_17 = arith.constant dense<0.000000e+00> : vector<6xf32>
    %23 = vector.multi_reduction <add>, %22, %cst_17 [1] : vector<6x16xf32> to vector<6xf32>
    %24 = vector.shape_cast %23 : vector<6xf32> to vector<6x1xf32>
    %cst_18 = arith.constant dense<0.000000e+00> : vector<6x16xf32>
    %25 = vector.multi_reduction <add>, %6, %cst_18 [2] : vector<6x16x16xf32> to vector<6x16xf32>
    %cst_19 = arith.constant dense<0.000000e+00> : vector<6xf32>
    %26 = vector.multi_reduction <add>, %25, %cst_19 [1] : vector<6x16xf32> to vector<6xf32>
    %27 = vector.shape_cast %26 : vector<6xf32> to vector<6x1xf32>
    %28 = arith.addf %24, %27 : vector<6x1xf32>
    %29 = arith.addf %19, %28 : vector<6x1xf32>
    %c0_20 = arith.constant 0 : index
    %c0_21 = arith.constant 0 : index
    %30 = vector.load %arg8[%c0_20, %c0_21] : memref<6x1xf32, #tpu.memory_space<vmem>>, vector<6x1xf32>
    tpu.vector_store %arg8[%c0_20, %c0_21], %29 {strides = array<i32>} : memref<6x1xf32, #tpu.memory_space<vmem>>, vector<6x1xf32>,
    %c0_i32_22 = arith.constant 0 : i32
    %31 = arith.cmpi eq, %arg2, %c0_i32_22 : i32
    %32 = arith.extui %31 : i1 to i32
    %c0_i32_23 = arith.constant 0 : i32
    %33 = arith.cmpi ne, %32, %c0_i32_23 : i32
    scf.if %33 {
      %c0_24 = arith.constant 0 : index
      %c0_25 = arith.constant 0 : index
      %34 = vector.load %arg7[%c0_24, %c0_25] : memref<6x1xf32, #tpu.memory_space<vmem>>, vector<6x1xf32>
      %c0_26 = arith.constant 0 : index
      %c0_27 = arith.constant 0 : index
      %c0_28 = arith.constant 0 : index
      %c0_29 = arith.constant 0 : index
      %35 = vector.load %arg5[%c0_26, %c0_27, %c0_28, %c0_29] : memref<1x1x6x1xf32, #tpu.memory_space<vmem>>, vector<1x1x6x1xf32>
      %36 = vector.shape_cast %35 : vector<1x1x6x1xf32> to vector<6x1xf32>
      %37 = vector.shape_cast %34 : vector<6x1xf32> to vector<1x1x6x1xf32>
      tpu.vector_store %arg5[%c0_26, %c0_27, %c0_28, %c0_29], %37 {strides = array<i32>} : memref<1x1x6x1xf32, #tpu.memory_space<vmem>>, vector<1x1x6x1xf32>,
      %c0_30 = arith.constant 0 : index
      %c0_31 = arith.constant 0 : index
      %38 = vector.load %arg8[%c0_30, %c0_31] : memref<6x1xf32, #tpu.memory_space<vmem>>, vector<6x1xf32>
      %c0_32 = arith.constant 0 : index
      %c0_33 = arith.constant 0 : index
      %c0_34 = arith.constant 0 : index
      %c0_35 = arith.constant 0 : index
      %39 = vector.load %arg6[%c0_32, %c0_33, %c0_34, %c0_35] : memref<1x1x6x1xf32, #tpu.memory_space<vmem>>, vector<1x1x6x1xf32>
      %40 = vector.shape_cast %39 : vector<1x1x6x1xf32> to vector<6x1xf32>
      %41 = vector.shape_cast %38 : vector<6x1xf32> to vector<1x1x6x1xf32>
      tpu.vector_store %arg6[%c0_32, %c0_33, %c0_34, %c0_35], %41 {strides = array<i32>} : memref<1x1x6x1xf32, #tpu.memory_space<vmem>>, vector<1x1x6x1xf32>,
    } else {
    }
    return
  }
  func.func @transform_0(%arg0: i32, %arg1: i32, %arg2: i32) -> (i32, i32, i32, i32) {
    %c1_i32 = arith.constant 1 : i32
    %0 = arith.muli %arg1, %c1_i32 : i32
    %1 = arith.addi %0, %arg2 : i32
    %c0_i32 = arith.constant 0 : i32
    %c0_i32_0 = arith.constant 0 : i32
    %c0_i32_1 = arith.constant 0 : i32
    return %arg0, %c0_i32, %1, %c0_i32_0 : i32, i32, i32, i32
  }
  func.func @transform_1(%arg0: i32, %arg1: i32, %arg2: i32) -> (i32, i32, i32, i32) {
    %c1_i32 = arith.constant 1 : i32
    %0 = arith.muli %arg1, %c1_i32 : i32
    %1 = arith.addi %0, %arg2 : i32
    %c0_i32 = arith.constant 0 : i32
    %c0_i32_0 = arith.constant 0 : i32
    %c0_i32_1 = arith.constant 0 : i32
    return %arg0, %c0_i32, %1, %c0_i32_0 : i32, i32, i32, i32
  }
  func.func @transform_2(%arg0: i32, %arg1: i32, %arg2: i32) -> (i32, i32, i32, i32) {
    %c0_i32 = arith.constant 0 : i32
    %c0_i32_0 = arith.constant 0 : i32
    %c0_i32_1 = arith.constant 0 : i32
    return %arg0, %arg1, %c0_i32, %c0_i32_0 : i32, i32, i32, i32
  }
  func.func @transform_3(%arg0: i32, %arg1: i32, %arg2: i32) -> (i32, i32, i32, i32) {
    %c0_i32 = arith.constant 0 : i32
    %c0_i32_0 = arith.constant 0 : i32
    %c0_i32_1 = arith.constant 0 : i32
    return %arg0, %arg1, %c0_i32, %c0_i32_0 : i32, i32, i32, i32
  }
}

</mosaic_0001>

<bundles_post_ra>
// kernel: multi_dice_loss.1
= control target key start
LH: loop header
LB: loop body
LE: loop exit
PB: predicated region body
PF: predicated region fallthrough
CT: control target
= control target key end

     0   :  { %9 = vsyncpa [#allocation5], 0  ;;  %s1528_s0 = inlined_call_operand.hbm [shape: s32[2,1,16,16], index: 0, kind: input, shape index: {}]   ;;  %s1529_s1 = inlined_call_operand.hbm [shape: f32[2,6,16,16], index: 1, kind: input, shape index: {}]   ;;  %s1530_s2 = inlined_call_operand.vmem [shape: f32[2,1,6,1], index: 2, kind: output, shape index: {0}]   ;;  %s1531_s3 = inlined_call_operand.vmem [shape: f32[2,1,6,1], index: 3, kind: output, shape index: {1}]  }
   0x1   :  { %11 = vsyncpa [#allocation5 + $0x1], 0 }
   0x2   :  { %12 = vsyncpa [#allocation7], 0 }
   0x3   :  { %14 = vsyncpa [#allocation7 + $0x1], 0  ;;  %s1113_s12 = smov 0   ;;  %s1115_s13 = smov 0  }
   0x4   :  { %s1117_s14 = smov 0   ;;  %s1119_s15 = smov 0  }
   0x5   :  { %s1121_s16 = smov 0   ;;  %s1123_s17 = smov 0  }
   0x6 LB: > { %s879_s18 = sadd.s32 4294967295, %s1086_s17   ;;  %s39_s19 = sadd.s32 1, %s1082_s16  ;;  %s1086_s17 = sphi %s1123_s17, %s20_s17   ;;  %s1082_s16 = sphi %s1121_s16, %s1542_s16   ;;  %s1078_s15 = sphi %s1119_s15, %s1541_s15   ;;  %s1074_s14 = sphi %s1117_s14, %s1540_s14   ;;  %s1070_s13 = sphi %s1115_s13, %s1539_s13   ;;  %s1066_s12 = sphi %s1113_s12, %s1538_s12  }
   0x7   : > { %p41_p0 = scmp.ge.s32.totalorder %s39_s19, 2  ;;  %s50_s20 = sadd.s32 1, %s1074_s14 }
   0x8   : > { %p57_p1 = scmp.ne.s32.totalorder %s1074_s14, %s1070_s13  ;;  %p58_p2 = scmp.eq.s32.totalorder %s1086_s17, 0 }
   0x9   : > { %s1544_s19 = smov (%p41_p0, %s39_s19), 0  ;;  %p63_p4 = scmp.ne.s32.totalorder %s1070_s13, %s1066_s12 }
   0xa   : > { %p1149_p3 = por %p58_p2, %p57_p1  ;;  %s45_s22 = ssub.s32 %s1082_s16, %s1544_s19 }
   0xb   : > { %p64_p5 = scmp.eq.s32.totalorder %s879_s18, 0  ;;  %p48_p6 = scmp.eq.s32.totalorder %s45_s22, 0 }
   0xc   : > { %p920_p8 = scmp.lt.s32.totalorder %s1086_s17, 2  ;;  %s1165_s25 = sand.u32 1, %s1074_s14  }
   0xd   : > { %p1156_p7 = por %p64_p5, %p63_p4  ;;  %s905_s26 = sshll.u32 %s1082_s16, 8 }
   0xe   : > { %s1162_s24 = scalar_select %p48_p6, %s1074_s14, %s50_s20  }
   0xf   : > { %s1534_s23 = scalar_select %p1156_p7, 1, 0 }
  0x10   : > { %s883_s27 = sshll.u32 %s1165_s25, 4  ;;  %s1172_s30 = scalar_lea.hbm %s1528_s0, %s905_s26 }
  0x11   : > { %s177_s4 = scalar_lea.vmem [#allocation4], %s883_s27  ;;  %p1176_p9 = pnand %p920_p8, %p1149_p3 }
  0x12   : > { %s187_s5 = sshll.u32 %s177_s4, 4  ;;  %s174_s7 = scalar_lea.sflag [#allocation5], %s1165_s25  ;;  %s1180_s5 = int_to_ptr.vmem [resolvable:$true] %s187_s5 }
  0x13   : > { %s972_s8 = scalar_lea.hbm %s1172_s30, 256  ;;  %p974_p11 = pneg %p1176_p9 }
  0x14   : > { %p973_p10 = scmp.ne.s32.totalorder %s1172_s30, %s972_s8  ;;  %s977_s11 = scalar_lea.hbm %s1528_s0, 512 }
  0x15   : > { %p978_p0 = scmp.lt.u32.totalorder %s1172_s30, %s1528_s0  ;;  %p979_p1 = scmp.lt.u32.totalorder %s977_s11, %s972_s8 }
  0x16   : > { %p975_p12 = pnand %p974_p11, %p973_p10  ;;  %p981_p3 = scmp.lt.u32.totalorder %s972_s8, %s1172_s30 }
  0x17   : > { %p980_p2 = por %p979_p1, %p978_p0 }
  0x18   : > { %p976_p13 = pneg %p975_p12 }
  0x19   : > { %p982_p4 = por %p981_p3, %p980_p2 }
  0x1b   : > { %p983_p5 = pnand %p982_p4, %p976_p13 }
  0x1d   : > { %986 = shalt.err (!%p983_p5)
}
  0x1e   : > { %s987_s20 = scalar_lea.vmem %s1180_s5, 256  ;;  %s1088_s21 = smov [#allocation4]  }
  0x1f   : > { %p988_p6 = scmp.ne.s32.totalorder %s1180_s5, %s987_s20  ;;  %s992_s22 = sshll.u32 %s1088_s21, 4  ;;  %s993_s22 = int_to_ptr.vmem [resolvable:$false] %s992_s22 }
  0x20   : > { %s994_s26 = scalar_lea.vmem %s993_s22, 512  ;;  %p995_p12 = scmp.lt.s32.totalorder %s1180_s5, %s993_s22 }
  0x21   : > { %p990_p8 = pnand %p988_p6, %p974_p11  ;;  %p996_p0 = scmp.lt.s32.totalorder %s994_s26, %s987_s20 }
  0x23   : > { %p991_p10 = pneg %p990_p8  ;;  %p997_p1 = por %p996_p0, %p995_p12 }
  0x25   : > { %p998_p2 = pnand %p997_p1, %p991_p10 }
  0x27   : > { %1001 = shalt.err (!%p998_p2)
}
  0x28   : > { %s1089_s27 = smov 128   ;;  %s1090_s28 = smov 8  }
  0x29   : > { %916 = dma.hbm_to_vmem [thread:$0]  (!%p1176_p9), %s1172_s30, 256, %s1180_s5, %s174_s7, %s1089_s27, %s1089_s27, %s1090_s28  }
  0x2a   : > { %p887_p13 = scmp.ge.s32.totalorder %s1086_s17, 1  ;;  %p219_p3 = scmp.lt.s32.totalorder %s1086_s17, 3 }
  0x2b   : > { %s906_s29 = smul.u32 96, %s1165_s25  ;;  %s198_s30 = scalar_lea.sflag [#allocation7], %s1165_s25 }
  0x2c   : > { %p1216_p4 = pnand %p887_p13, %p219_p3  ;;  %s907_s8 = smul.u32 1536, %s1082_s16 }
  0x2d   : > { %s201_s12 = scalar_lea.vmem [#allocation6], %s906_s29  ;;  %s1007_s21 = scalar_lea.hbm %s1529_s1, 3072 }
  0x2e   : > { %s1224_s11 = scalar_lea.hbm %s1529_s1, %s907_s8  ;;  %s211_s18 = sshll.u32 %s201_s12, 4  ;;  %s1226_s18 = int_to_ptr.vmem [resolvable:$true] %s211_s18 }
  0x2f   : > { %s1002_s5 = scalar_lea.hbm %s1224_s11, 1536  ;;  %p1008_p10 = scmp.lt.u32.totalorder %s1224_s11, %s1529_s1 }
  0x30   : > { %p1003_p5 = scmp.ne.s32.totalorder %s1224_s11, %s1002_s5  ;;  %p1009_p12 = scmp.lt.u32.totalorder %s1007_s21, %s1002_s5 }
  0x31   : > { %p1011_p1 = scmp.lt.u32.totalorder %s1002_s5, %s1224_s11 }
  0x32   : > { %p1005_p6 = pnand %p1003_p5, %p974_p11  ;;  %p1010_p0 = por %p1009_p12, %p1008_p10 }
  0x34   : > { %p1006_p8 = pneg %p1005_p6  ;;  %p1012_p2 = por %p1011_p1, %p1010_p0 }
  0x36   : > { %p1013_p13 = pnand %p1012_p2, %p1006_p8 }
  0x38   : > { %1016 = shalt.err (!%p1013_p13)
}
  0x39   : > { %s1017_s29 = scalar_lea.vmem %s1226_s18, 1536  ;;  %s1091_s8 = smov [#allocation6]  }
  0x3a   : > { %p1018_p3 = scmp.ne.s32.totalorder %s1226_s18, %s1017_s29  ;;  %s1022_s9 = sshll.u32 %s1091_s8, 4  ;;  %s1023_s9 = int_to_ptr.vmem [resolvable:$false] %s1022_s9 }
  0x3b   : > { %s1024_s10 = scalar_lea.vmem %s1023_s9, 3072  ;;  %p1025_p7 = scmp.lt.s32.totalorder %s1226_s18, %s1023_s9 }
  0x3c   : > { %p1020_p5 = pnand %p1018_p3, %p974_p11  ;;  %p1026_p10 = scmp.lt.s32.totalorder %s1024_s10, %s1017_s29 }
  0x3e   : > { %p1021_p6 = pneg %p1020_p5  ;;  %p1027_p12 = por %p1026_p10, %p1025_p7 }
  0x40   : > { %p1028_p0 = pnand %p1027_p12, %p1021_p6 }
  0x42   : > { %1031 = shalt.err (!%p1028_p0)
}
  0x43   : > { %919 = dma.hbm_to_vmem [thread:$0]  (!%p1176_p9), %s1224_s11, 1536, %s1226_s18, %s198_s30, %s1089_s27, %s1089_s27, %s1090_s28  }
  0x44   : > { %223 = sbr.rel (%p1216_p4) target bundleno = 450 (0x1c2), region = 28  ;;  %s225_s12 = sand.u32 (!%p1216_p4), 1, %s1070_s13  }
  0x45   : > { %s888_s5 = sshll.u32 (!%p1216_p4), %s225_s12, 4  ;;  %s226_s7 = scalar_lea.sflag (!%p1216_p4), [#allocation5], %s225_s12 }
  0x46   : > { %s229_s20 = scalar_lea.vmem (!%p1216_p4), [#allocation4], %s888_s5  ;;  %p1537_p7 = scmp.ne.s32.totalorder (!%p1216_p4), %s1534_s23, 0 }
  0x4b   : > { %1057 = dma.done.wait (%p1537_p7), %s226_s7, 256  }
  0x4c   : > { %1059 = vsyncadd (%p1537_p7), %s226_s7, 4294967040  ;;  %s908_s6 = smul.u32 96, %s225_s12  ;;  %s235_s25 = scalar_lea.sflag [#allocation7], %s225_s12 }
  0x4e   : > { %s1264_s21 = scalar_lea.vmem [#allocation6], %s908_s6 }
  0x4f   : > { %1061 = dma.done.wait (%p1537_p7), %s235_s25, 1536  }
  0x50   : > { %1063 = vsyncadd (%p1537_p7), %s235_s25, 4294965760  ;;  %vm339_vm0 = vcmask 130048   ;;  %v303_v0 = vld [vmem:[%s1264_s21 + $0x8] sm:$0xff]  ;;  %v302_v1 = vld [vmem:[%s1264_s21] sm:$0xff]  ;;  %v1092_v6 = vmov 0.0   ;;  %vm399_vm13 = vcmask 130112  }
  0x51   : > { %v1272_v2 = vld [vmem:[%s229_s20] sm:$0xff]  ;;  %v603_v3 = vsel %vm339_vm0, %v303_v0, 0.0  ;;  %v600_v4 = vsel %vm339_vm0, %v302_v1, 0.0  ;;  %v1278_v5 = vld [vmem:[%s229_s20 + $0x8] sm:$0xff]  ;;  %vm446_vm14 = vcmask 1041409   ;;  %vm448_vm15 = vcmask 1042434  }
  0x52   : > { %vm316_vm1 = vcmp.eq.s32.totalorder %v1272_v2, 1  ;;  %vm314_vm2 = vcmp.eq.s32.totalorder %v1272_v2, 0  ;;  %604 = vadd.xlane.f32.xlu1 %v603_v3  ;;  %601 = vadd.xlane.f32.xlu0 %v600_v4  ;;  %vm317_vm3 = vcmp.eq.s32.totalorder %v1278_v5, 1  ;;  %vm315_vm4 = vcmp.eq.s32.totalorder %v1278_v5, 0  ;;  %v305_v15 = vld [vmem:[%s1264_s21 + $0x18] sm:$0xff]  ;;  %v304_v16 = vld [vmem:[%s1264_s21 + $0x10] sm:$0xff] }
  0x53   : > { %v893_v7 = vsel %vm316_vm1, 1.0, %v1092_v6  ;;  %v891_v8 = vsel %vm314_vm2, 1.0, %v1092_v6  ;;  %v894_v11 = vsel %vm317_vm3, 1.0, %v1092_v6  ;;  %v892_v12 = vsel %vm315_vm4, 1.0, %v1092_v6  ;;  %v307_v23 = vld [vmem:[%s1264_s21 + $0x28] sm:$0xff]  ;;  %v306_v24 = vld [vmem:[%s1264_s21 + $0x20] sm:$0xff] }
  0x54   : > { %v495_v9 = vsel %vm339_vm0, %v893_v7, 0.0  ;;  %v489_v10 = vsel %vm339_vm0, %v891_v8, 0.0  ;;  %v498_v13 = vsel %vm339_vm0, %v894_v11, 0.0  ;;  %v492_v14 = vsel %vm339_vm0, %v892_v12, 0.0  ;;  %v309_v39 = vld [vmem:[%s1264_s21 + $0x38] sm:$0xff]  ;;  %v308_v40 = vld [vmem:[%s1264_s21 + $0x30] sm:$0xff] }
  0x55   : > { %vm319_vm5 = vcmp.eq.s32.totalorder %v1278_v5, 2  ;;  %vm318_vm6 = vcmp.eq.s32.totalorder %v1272_v2, 2  ;;  %v609_v17 = vsel %vm339_vm0, %v305_v15, 0.0  ;;  %v606_v18 = vsel %vm339_vm0, %v304_v16, 0.0  ;;  %v311_v51 = vld [vmem:[%s1264_s21 + $0x48] sm:$0xff]  ;;  %v310_v52 = vld [vmem:[%s1264_s21 + $0x40] sm:$0xff] }
  0x56   : > { %496 = vadd.xlane.f32.xlu1 %v495_v9  ;;  %490 = vadd.xlane.f32.xlu0 %v489_v10  ;;  %v896_v19 = vsel %vm319_vm5, 1.0, %v1092_v6  ;;  %v895_v20 = vsel %vm318_vm6, 1.0, %v1092_v6  ;;  %v615_v25 = vsel %vm339_vm0, %v307_v23, 0.0  ;;  %v612_v26 = vsel %vm339_vm0, %v306_v24, 0.0  ;;  %v313_v63 = vld [vmem:[%s1264_s21 + $0x58] sm:$0xff]  ;;  %p279_p9 = scmp.lt.s32.totalorder %s1078_s15, 1 }
  0x57   : > { %v504_v21 = vsel %vm339_vm0, %v896_v19, 0.0  ;;  %v501_v22 = vsel %vm339_vm0, %v895_v20, 0.0  ;;  %v328_v27 = vsel %vm315_vm4, %v303_v0, 0.0  ;;  %v327_v28 = vsel %vm314_vm2, %v302_v1, 0.0  ;;  %v312_v0 = vld [vmem:[%s1264_s21 + $0x50] sm:$0xff] }
  0x58   : > { %v343_v29 = vsel %vm339_vm0, %v328_v27, 0.0  ;;  %v340_v30 = vsel %vm339_vm0, %v327_v28, 0.0  ;;  %v330_v31 = vsel %vm317_vm3, %v305_v15, 0.0  ;;  %v329_v32 = vsel %vm316_vm1, %v304_v16, 0.0  ;;  %s1546_s15 = smov (!%p279_p9, %s1078_s15), 1 }
  0x59   : > { %vm321_vm7 = vcmp.eq.s32.totalorder %v1278_v5, 3  ;;  %vm320_vm8 = vcmp.eq.s32.totalorder %v1272_v2, 3  ;;  %v349_v33 = vsel %vm339_vm0, %v330_v31, 0.0  ;;  %v346_v34 = vsel %vm339_vm0, %v329_v32, 0.0  ;;  %s889_s23 = sshll.u32 %s1546_s15, 3 }
  0x5a   : > { %499 = vadd.xlane.f32.xlu1 %v498_v13  ;;  %493 = vadd.xlane.f32.xlu0 %v492_v14  ;;  %v898_v35 = vsel %vm321_vm7, 1.0, %v1092_v6  ;;  %v897_v36 = vsel %vm320_vm8, 1.0, %v1092_v6  ;;  %v621_v41 = vsel %vm339_vm0, %v309_v39, 0.0  ;;  %v618_v42 = vsel %vm339_vm0, %v308_v40, 0.0  ;;  %s292_s4 = scalar_lea.vmem %s1531_s3, %s889_s23  ;;  %s285_s30 = scalar_lea.vmem %s1530_s2, %s889_s23 }
  0x5b   : > { %v510_v37 = vsel %vm339_vm0, %v898_v35, 0.0  ;;  %v507_v38 = vsel %vm339_vm0, %v897_v36, 0.0  ;;  %v332_v43 = vsel %vm319_vm5, %v307_v23, 0.0  ;;  %v331_v44 = vsel %vm318_vm6, %v306_v24, 0.0 }
  0x5c   : > { %vm323_vm9 = vcmp.eq.s32.totalorder %v1278_v5, 4  ;;  %vm322_vm10 = vcmp.eq.s32.totalorder %v1272_v2, 4  ;;  %v355_v45 = vsel %vm339_vm0, %v332_v43, 0.0  ;;  %v352_v46 = vsel %vm339_vm0, %v331_v44, 0.0 }
  0x5d   : > { %v900_v47 = vsel %vm323_vm9, 1.0, %v1092_v6  ;;  %v899_v48 = vsel %vm322_vm10, 1.0, %v1092_v6  ;;  %v627_v53 = vsel %vm339_vm0, %v311_v51, 0.0  ;;  %v624_v54 = vsel %vm339_vm0, %v310_v52, 0.0 }
  0x5e   : > { %610 = vadd.xlane.f32.xlu1 %v609_v17  ;;  %607 = vadd.xlane.f32.xlu0 %v606_v18  ;;  %v516_v49 = vsel %vm339_vm0, %v900_v47, 0.0  ;;  %v513_v50 = vsel %vm339_vm0, %v899_v48, 0.0  ;;  %v334_v55 = vsel %vm321_vm7, %v309_v39, 0.0  ;;  %v333_v56 = vsel %vm320_vm8, %v308_v40, 0.0 }
  0x5f   : > { %vm325_vm11 = vcmp.eq.s32.totalorder %v1278_v5, 5  ;;  %vm324_vm12 = vcmp.eq.s32.totalorder %v1272_v2, 5  ;;  %v361_v57 = vsel %vm339_vm0, %v334_v55, 0.0  ;;  %v358_v58 = vsel %vm339_vm0, %v333_v56, 0.0 }
  0x60   : > { %v902_v59 = vsel %vm325_vm11, 1.0, %v1092_v6  ;;  %v901_v60 = vsel %vm324_vm12, 1.0, %v1092_v6  ;;  %v633_v1 = vsel %vm339_vm0, %v313_v63, 0.0  ;;  %v630_v3 = vsel %vm339_vm0, %v312_v0, 0.0 }
  0x61   : > { %v522_v61 = vsel %vm339_vm0, %v902_v59, 0.0  ;;  %v519_v62 = vsel %vm339_vm0, %v901_v60, 0.0  ;;  %v336_v4 = vsel %vm323_vm9, %v311_v51, 0.0  ;;  %v335_v7 = vsel %vm322_vm10, %v310_v52, 0.0 }
  0x62   : > { %505 = vadd.xlane.f32.xlu1 %v504_v21  ;;  %502 = vadd.xlane.f32.xlu0 %v501_v22  ;;  %v367_v8 = vsel %vm339_vm0, %v336_v4, 0.0  ;;  %v364_v9 = vsel %vm339_vm0, %v335_v7, 0.0  ;;  %v338_v10 = vsel %vm325_vm11, %v313_v63, 0.0  ;;  %v337_v11 = vsel %vm324_vm12, %v312_v0, 0.0 }
  0x63   : > { %v373_v12 = vsel %vm339_vm0, %v338_v10, 0.0  ;;  %v370_v13 = vsel %vm339_vm0, %v337_v11, 0.0  ;;  %v388_v28 = vlaneseq  ;;  %vm450_vm0 = vcmask 1043459  }
  0x64   : > { %vm452_vm1 = vcmask 1044484   ;;  %vm454_vm2 = vcmask 1045509   ;;  %vm457_vm3 = vcmask 128000   ;;  %vm297_vm4 = vcmask 5120  }
  0x65   : > { %v389_v31 = vand.u32 127, %v388_v28  ;;  %299 = vst.msk [vmem:[#allocation3] sm:$0x3f] %vm297_vm4, %v1092_v6  ;;  %298 = vst.msk [vmem:[#allocation2] sm:$0x3f] %vm297_vm4, %v1092_v6 }
  0x66   : > { %616 = vadd.xlane.f32.xlu1 %v615_v25  ;;  %613 = vadd.xlane.f32.xlu0 %v612_v26 }
  0x67   : > { %v394_v35 = vadd.s32 4294967288, %v389_v31 }
  0x6a   : > { %344 = vadd.xlane.f32.xlu1 %v343_v29  ;;  %341 = vadd.xlane.f32.xlu0 %v340_v30 }
  0x6e   : > { %350 = vadd.xlane.f32.xlu1 %v349_v33  ;;  %347 = vadd.xlane.f32.xlu0 %v346_v34  ;;  %v391_v34 = vshrl.u32 %v388_v28, 7 }
  0x72   : > { %511 = vadd.xlane.f32.xlu1 %v510_v37  ;;  %508 = vadd.xlane.f32.xlu0 %v507_v38  ;;  %v1410_v38 = vsub.s32 %v394_v35, %v391_v34 }
  0x76   : > { %622 = vadd.xlane.f32.xlu1 %v621_v41  ;;  %619 = vadd.xlane.f32.xlu0 %v618_v42  ;;  %v1412_v41 = vsub.s32 %v389_v31, %v391_v34 }
  0x7a   : > { %356 = vadd.xlane.f32.xlu1 %v355_v45  ;;  %353 = vadd.xlane.f32.xlu0 %v352_v46 }
  0x7e   : > { %517 = vadd.xlane.f32.xlu1 %v516_v49  ;;  %514 = vadd.xlane.f32.xlu0 %v513_v50 }
  0x82   : > { %628 = vadd.xlane.f32.xlu1 %v627_v53  ;;  %625 = vadd.xlane.f32.xlu0 %v624_v54 }
  0x86   : > { %362 = vadd.xlane.f32.xlu1 %v361_v57  ;;  %359 = vadd.xlane.f32.xlu0 %v358_v58 }
  0x8a   : > { %523 = vadd.xlane.f32.xlu1 %v522_v61  ;;  %520 = vadd.xlane.f32.xlu0 %v519_v62 }
  0x8e   : > { %634 = vadd.xlane.f32.xlu1 %v633_v1  ;;  %631 = vadd.xlane.f32.xlu0 %v630_v3 }
  0x92   : > { %368 = vadd.xlane.f32.xlu1 %v367_v8  ;;  %365 = vadd.xlane.f32.xlu0 %v364_v9 }
  0x96   : > { %374 = vadd.xlane.f32.xlu1 %v373_v12  ;;  %371 = vadd.xlane.f32.xlu0 %v370_v13 }
  0xdf   : > { %v1394_v14 = vpop.xlane.xlu1 %604  ;;  %v1396_v15 = vpop.xlane.xlu0 %601 }
  0xe0   : > { %v655_v62 = vrot.slane %v1394_v14, %v1410_v38  ;;  %v651_v63 = vrot.slane %v1396_v15, %v1412_v41 }
  0xe2   : > { %v656_v15 = vsel %vm399_vm13, %v655_v62, %v651_v63 }
  0xe3   : > { %v497_v16 = vpop.xlane.xlu1 %496  ;;  %v491_v17 = vpop.xlane.xlu0 %490 }
  0xe4   : > { %v549_v44 = vrot.slane %v497_v16, %v1412_v41  ;;  %v540_v45 = vrot.slane %v491_v17, %v1412_v41 }
  0xe7   : > { %v500_v18 = vpop.xlane.xlu1 %499  ;;  %v494_v5 = vpop.xlane.xlu0 %493 }
  0xe8   : > { %v553_v42 = vrot.slane %v500_v18, %v1410_v38  ;;  %v544_v43 = vrot.slane %v494_v5, %v1410_v38 }
  0xea   : > { %v554_v48 = vsel %vm399_vm13, %v553_v42, %v549_v44  ;;  %v545_v49 = vsel %vm399_vm13, %v544_v43, %v540_v45 }
  0xeb   : > { %v611_v19 = vpop.xlane.xlu1 %610  ;;  %v608_v20 = vpop.xlane.xlu0 %607  ;;  %v591_v0 = vsel %vm446_vm14, %v554_v48, %v545_v49 }
  0xec   : > { %v664_v52 = vrot.slane %v611_v19, %v1410_v38  ;;  %v660_v53 = vrot.slane %v608_v20, %v1412_v41 }
  0xee   : > { %v665_v3 = vsel %vm399_vm13, %v664_v52, %v660_v53 }
  0xef   : > { %v506_v2 = vpop.xlane.xlu1 %505  ;;  %v503_v21 = vpop.xlane.xlu0 %502  ;;  %v702_v5 = vsel %vm446_vm14, %v665_v3, %v656_v15 }
  0xf0   : > { %v562_v50 = vrot.slane %v506_v2, %v1410_v38  ;;  %v558_v51 = vrot.slane %v503_v21, %v1412_v41 }
  0xf2   : > { %v563_v1 = vsel %vm399_vm13, %v562_v50, %v558_v51 }
  0xf3   : > { %v617_v22 = vpop.xlane.xlu1 %616  ;;  %v614_v23 = vpop.xlane.xlu0 %613  ;;  %v592_v16 = vsel %vm448_vm15, %v563_v1, %v591_v0  ;;  %v464_v1 = vld [vmem:[#allocation3] sm:$0x3f] }
  0xf4   : > { %v673_v56 = vrot.slane %v617_v22, %v1410_v38  ;;  %v669_v57 = vrot.slane %v614_v23, %v1412_v41 }
  0xf6   : > { %v674_v9 = vsel %vm399_vm13, %v673_v56, %v669_v57 }
  0xf7   : > { %v1398_v24 = vpop.xlane.xlu1 %344  ;;  %v1400_v25 = vpop.xlane.xlu0 %341  ;;  %v703_v20 = vsel %vm448_vm15, %v674_v9, %v702_v5 }
  0xf8   : > { %v398_v23 = vrot.slane %v1398_v24, %v1410_v38  ;;  %v393_v24 = vrot.slane %v1400_v25, %v1412_v41 }
  0xfa   : > { %v400_v51 = vsel %vm399_vm13, %v398_v23, %v393_v24 }
  0xfb   : > { %v1402_v26 = vpop.xlane.xlu1 %350  ;;  %v1404_v27 = vpop.xlane.xlu0 %347 }
  0xfc   : > { %v408_v28 = vrot.slane %v1402_v26, %v1410_v38 }
  0xff   : > { %v512_v29 = vpop.xlane.xlu1 %511  ;;  %v509_v30 = vpop.xlane.xlu0 %508 }
 0x100   : > { %v571_v54 = vrot.slane %v512_v29, %v1410_v38  ;;  %v567_v55 = vrot.slane %v509_v30, %v1412_v41 }
 0x102   : > { %v572_v4 = vsel %vm399_vm13, %v571_v54, %v567_v55 }
 0x103   : > { %v623_v32 = vpop.xlane.xlu1 %622  ;;  %v620_v33 = vpop.xlane.xlu0 %619  ;;  %v593_v19 = vsel %vm450_vm0, %v572_v4, %v592_v16 }
 0x104   : > { %v682_v7 = vrot.slane %v623_v32, %v1410_v38  ;;  %v678_v8 = vrot.slane %v620_v33, %v1412_v41  ;;  %v404_v33 = vrot.slane %v1404_v27, %v1412_v41 }
 0x106   : > { %v683_v2 = vsel %vm399_vm13, %v682_v7, %v678_v8  ;;  %v326_v7 = vld [vmem:[#allocation2] sm:$0x3f] }
 0x107   : > { %v1406_v36 = vpop.xlane.xlu1 %356  ;;  %v1408_v37 = vpop.xlane.xlu0 %353  ;;  %v704_v42 = vsel %vm450_vm0, %v683_v2, %v703_v20 }
 0x108   : > { %v417_v26 = vrot.slane %v1406_v36, %v1410_v38  ;;  %v409_v36 = vsel %vm399_vm13, %v408_v28, %v404_v33 }
 0x109   : > { %v447_v53 = vsel %vm446_vm14, %v409_v36, %v400_v51 }
 0x10b   : > { %v518_v39 = vpop.xlane.xlu1 %517  ;;  %v515_v40 = vpop.xlane.xlu0 %514 }
 0x10c   : > { %v580_v58 = vrot.slane %v518_v39, %v1410_v38  ;;  %v576_v59 = vrot.slane %v515_v40, %v1412_v41  ;;  %v413_v40 = vrot.slane %v1408_v37, %v1412_v41 }
 0x10e   : > { %v581_v10 = vsel %vm399_vm13, %v580_v58, %v576_v59  ;;  %v418_v50 = vsel %vm399_vm13, %v417_v26, %v413_v40 }
 0x10f   : > { %v629_v46 = vpop.xlane.xlu1 %628  ;;  %v626_v47 = vpop.xlane.xlu0 %625  ;;  %v594_v22 = vsel %vm452_vm1, %v581_v10, %v593_v19  ;;  %v449_v57 = vsel %vm448_vm15, %v418_v50, %v447_v53 }
 0x110   : > { %v691_v11 = vrot.slane %v629_v46, %v1410_v38  ;;  %v687_v12 = vrot.slane %v626_v47, %v1412_v41 }
 0x112   : > { %v692_v29 = vsel %vm399_vm13, %v691_v11, %v687_v12 }
 0x113   : > { %v363_v60 = vpop.xlane.xlu1 %362  ;;  %v360_v61 = vpop.xlane.xlu0 %359  ;;  %v705_v45 = vsel %vm452_vm1, %v692_v29, %v704_v42 }
 0x114   : > { %v426_v27 = vrot.slane %v363_v60, %v1410_v38  ;;  %v422_v43 = vrot.slane %v360_v61, %v1412_v41 }
 0x116   : > { %v427_v52 = vsel %vm399_vm13, %v426_v27, %v422_v43 }
 0x117   : > { %v524_v13 = vpop.xlane.xlu1 %523  ;;  %v521_v14 = vpop.xlane.xlu0 %520  ;;  %v451_v60 = vsel %vm450_vm0, %v427_v52, %v449_v57 }
 0x118   : > { %v589_v17 = vrot.slane %v524_v13, %v1410_v38  ;;  %v585_v18 = vrot.slane %v521_v14, %v1412_v41 }
 0x11a   : > { %v590_v21 = vsel %vm399_vm13, %v589_v17, %v585_v18 }
 0x11b   : > { %v635_v30 = vpop.xlane.xlu1 %634  ;;  %v632_v31 = vpop.xlane.xlu0 %631  ;;  %v595_v32 = vsel %vm454_vm2, %v590_v21, %v594_v22 }
 0x11c   : > { %v700_v34 = vrot.slane %v635_v30, %v1410_v38  ;;  %v696_v35 = vrot.slane %v632_v31, %v1412_v41  ;;  %v597_v39 = vsel %vm457_vm3, %v595_v32, 0.0 }
 0x11d   : > { %598 = vadd.xlane.f32.xlu0 %v597_v39 }
 0x11e   : > { %v701_v44 = vsel %vm399_vm13, %v700_v34, %v696_v35 }
 0x11f   : > { %v369_v46 = vpop.xlane.xlu1 %368  ;;  %v366_v47 = vpop.xlane.xlu0 %365  ;;  %v706_v25 = vsel %vm454_vm2, %v701_v44, %v705_v45 }
 0x120   : > { %v435_v48 = vrot.slane %v369_v46, %v1410_v38  ;;  %v431_v37 = vrot.slane %v366_v47, %v1412_v41  ;;  %v708_v49 = vsel %vm457_vm3, %v706_v25, 0.0 }
 0x121   : > { %709 = vadd.xlane.f32.xlu1 %v708_v49 }
 0x122   : > { %v436_v54 = vsel %vm399_vm13, %v435_v48, %v431_v37 }
 0x123   : > { %v375_v55 = vpop.xlane.xlu1 %374  ;;  %v372_v56 = vpop.xlane.xlu0 %371  ;;  %v453_v62 = vsel %vm452_vm1, %v436_v54, %v451_v60 }
 0x124   : > { %v444_v58 = vrot.slane %v375_v55, %v1410_v38  ;;  %v440_v59 = vrot.slane %v372_v56, %v1412_v41 }
 0x126   : > { %v445_v61 = vsel %vm399_vm13, %v444_v58, %v440_v59 }
 0x127   : > { %v455_v63 = vsel %vm454_vm2, %v445_v61, %v453_v62 }
 0x128   : > { %v458_v0 = vsel %vm457_vm3, %v455_v63, 0.0 }
 0x129   : > { %459 = vadd.xlane.f32.xlu0 %v458_v0 }
 0x1aa   : > { %v599_v38 = vpop.xlane.xlu0 %598 }
 0x1ae   : > { %v710_v41 = vpop.xlane.xlu1 %709 }
 0x1af   : > { %v711_v3 = vadd.f32 %v710_v41, %v599_v38 }
 0x1b1   : > { %v712_v4 = vadd.f32 %v711_v3, %v464_v1 }
 0x1b3   : > { %713 = vst.msk [vmem:[#allocation3] sm:$0x3f] %vm297_vm4, %v712_v4 }
 0x1b6   : > { %v460_v8 = vpop.xlane.xlu0 %459 }
 0x1b7   : > { %v461_v9 = vadd.f32 %v460_v8, %v326_v7 }
 0x1b9   : > { %463 = vst.msk [vmem:[#allocation2] sm:$0x3f] %vm297_vm4, %v461_v9 }
 0x1ba   : > { %v719_v6 = vld [vmem:[#allocation3] sm:$0x3f] }
 0x1bb   : > { %720 = vst.msk [vmem:[%s292_s4] sm:$0x3f] %vm297_vm4, %v719_v6 }
 0x1c0   : > { %v717_v10 = vld [vmem:[#allocation2] sm:$0x3f] }
 0x1c1   : > { %718 = vst.msk [vmem:[%s285_s30] sm:$0x3f] %vm297_vm4, %v717_v10 }
 0x1c2 PF: > { %s20_s17 = sadd.s32 1, %s1086_s17   ;;  %s1538_s12 = smov %s1070_s13 }
 0x1c3   : > { %p17_p11 = scmp.ge.s32.totalorder %s20_s17, 4   ;;  %s1539_s13 = smov %s1074_s14 }
 0x1c4   : > { %s1540_s14 = smov %s1162_s24  ;;  %s1541_s15 = smov %s1082_s16 }
 0x1c5   : > { %s1542_s16 = smov %s1544_s19  ;;  %19 = sbr.rel (!%p17_p11) target bundleno = 6 (0x6), region = 101 }
 0x1cc   :  { %766 = vsyncpa [#allocation5], 1 }
 0x1cd   :  { %768 = vsyncpa [#allocation5 + $0x1], 1 }
 0x1ce   :  { %769 = vsyncpa [#allocation7], 1 }
 0x1cf   :  { %771 = vsyncpa [#allocation7 + $0x1], 1 }

</bundles_post_ra>
